<compile_context>
chip_gen: v5e
topology: v5e:2x2
jax: 0.10.0
libtpu: 0.0.40
codegen_flags: <defaults>
</compile_context>

<pallas_src>
import functools

import jax
import jax.numpy as jnp
from jax.experimental import pallas as pl
from jax.experimental.pallas import tpu as pltpu

_LANES = 128                    # vreg lane width
_ACC_ROWS = 8                   # (8, 128) f32 vector accumulator
_SUB_ROWS = 512                 # in-kernel sub-chunk; bounds f32 temps to ~256 KiB
_TARGET_BLOCK_BYTES = 4 << 20   # ~4 MiB of input per operand per pipeline buffer
_MAX_VMEM_LIMIT = 48 << 20      # stays well inside v7x's 64 MiB physical VMEM


@functools.lru_cache(maxsize=1)
def _default_num_splits() -> int:
    """Leading 'parallel' grid splits: 2 on dual-TensorCore chips, else 1."""
    try:
        kind = jax.devices()[0].device_kind.lower()
    except Exception:
        return 2
    # Single-TensorCore chips: v5e ("TPU v5 lite") and v6e ("TPU v6 lite").
    if "lite" in kind or "v5e" in kind or "v6e" in kind:
        return 1
    return 2


def _l1_partial_sum_kernel(es_ref, ta_ref, out_ref, *,
                           block_rows, sub_rows, blocks_per_split,
                           blocks_total, rows_total,
                           has_partial_last, has_padded_steps):
    """Accumulate per-split partial sums of |es - ta| into a resident (8,128) f32 block."""
    p = pl.program_id(0)                     # parallel split
    k = pl.program_id(1)                     # sequential accumulation axis
    blk = p * blocks_per_split + k           # logical (unclamped) block index

    @pl.when(k == 0)
    def _init():
        out_ref[...] = jnp.zeros_like(out_ref)

    n_sub = block_rows // sub_rows           # static Python int

    def accumulate(masked):
        # Sub-chunk loop keeps f32 temps bounded (no full-block diff in VMEM)
        # and folds everything into an (8,128) slab with pure VPU vreg adds.
        def step(s, acc):
            r0 = pl.multiple_of(s * sub_rows, _ACC_ROWS)
            e = es_ref[pl.ds(r0, sub_rows), :].astype(jnp.float32)
            t = ta_ref[pl.ds(r0, sub_rows), :].astype(jnp.float32)
            d = jnp.abs(e - t)
            if masked:
                # Global row ids; zero rows beyond the real array (boundary block).
                row_ids = (blk * block_rows + s * sub_rows
                           + jax.lax.broadcasted_iota(jnp.int32, (sub_rows, _LANES), 0))
                d = jnp.where(row_ids < rows_total, d, 0.0)
            return acc + jnp.sum(
                d.reshape(sub_rows // _ACC_ROWS, _ACC_ROWS, _LANES), axis=0)

        acc0 = jnp.zeros((_ACC_ROWS, _LANES), jnp.float32)
        acc = jax.lax.fori_loop(0, n_sub, step, acc0, unroll=(n_sub <= 8))
        out_ref[...] += acc

    is_last_real = blk == (blocks_total - 1)

    if has_partial_last:
        # Fast unmasked path for interior blocks; masked path only for the single
        # final (partial) block; clamp-padded split steps are skipped entirely.
        if has_padded_steps:
            fast_pred = jnp.logical_and(blk < blocks_total,
                                        jnp.logical_not(is_last_real))
        else:
            fast_pred = jnp.logical_not(is_last_real)

        @pl.when(fast_pred)
        def _fast():
            accumulate(False)

        @pl.when(is_last_real)
        def _masked():
            accumulate(True)
    else:
        if has_padded_steps:
            @pl.when(blk < blocks_total)
            def _fast():
                accumulate(False)
        else:
            accumulate(False)


def l1_mean_pallas(es: jax.Array, ta: jax.Array) -> jax.Array:
    """mean(|es - ta|) computed with a Pallas TPU reduction kernel."""
    assert es.shape == ta.shape, "es/ta must have identical shapes"
    n = es.size
    if n == 0:
        return jnp.float32(0.0)

    flat_e = es.reshape(-1)   # native dtype streams from HBM; cast happens in-kernel
    flat_t = ta.reshape(-1)

    rows = n // _LANES        # full lane-dense rows handled by the kernel
    main_n = rows * _LANES
    tail = n - main_n         # < 128 leftover elements (plain JAX below)

    e_item = jnp.dtype(es.dtype).itemsize
    t_item = jnp.dtype(ta.dtype).itemsize
    packing = max(1, 4 // min(e_item, t_item))   # sublane packing of narrowest dtype
    min_rows = _ACC_ROWS * packing

    total = jnp.float32(0.0)
    kernel_elems = 0

    if rows >= min_rows:
        kernel_elems = main_n
        e2 = (flat_e if tail == 0 else flat_e[:main_n]).reshape(rows, _LANES)
        t2 = (flat_t if tail == 0 else flat_t[:main_n]).reshape(rows, _LANES)

        # ---- dtype-aware tiling: ~4 MiB of input per operand per buffer --------
        usable_rows = (rows // min_rows) * min_rows
        sub_rows = min(_SUB_ROWS, usable_rows)
        sub_rows = max(min_rows, (sub_rows // min_rows) * min_rows)
        target_rows = max(sub_rows,
                          _TARGET_BLOCK_BYTES // (_LANES * max(e_item, t_item)))
        block_rows = max(sub_rows,
                         min((target_rows // sub_rows) * sub_rows,
                             (rows // sub_rows) * sub_rows))

        blocks_total = pl.cdiv(rows, block_rows)
        has_partial_last = (rows % block_rows) != 0

        n_splits = max(1, min(_default_num_splits(), blocks_total))
        blocks_per_split = pl.cdiv(blocks_total, n_splits)
        has_padded_steps = (n_splits * blocks_per_split) != blocks_total

        if has_padded_steps:
            def in_index_map(p, k):
                # Clamp: padded split steps re-read the last real block; the kernel
                # skips their accumulation entirely (blk >= blocks_total).
                return (jnp.minimum(p * blocks_per_split + k, blocks_total - 1), 0)
        else:
            def in_index_map(p, k):
                return (p * blocks_per_split + k, 0)

        kernel = functools.partial(
            _l1_partial_sum_kernel,
            block_rows=block_rows,
            sub_rows=sub_rows,
            blocks_per_split=blocks_per_split,
            blocks_total=blocks_total,
            rows_total=rows,
            has_partial_last=has_partial_last,
            has_padded_steps=has_padded_steps)

        # 2 operands x 2 pipeline buffers of native-dtype blocks, plus headroom for
        # the bounded f32 sub-chunk temps and the tiny (8,128) accumulators.
        vmem_limit = int(2 * block_rows * _LANES * (e_item + t_item) + (8 << 20))
        vmem_limit = min(max(vmem_limit, 16 << 20), _MAX_VMEM_LIMIT)

        bytes_accessed = main_n * (e_item + t_item) + n_splits * _ACC_ROWS * _LANES * 4

        partials = pl.pallas_call(
            kernel,
            out_shape=jax.ShapeDtypeStruct((n_splits, _ACC_ROWS, _LANES), jnp.float32),
            grid_spec=pltpu.PrefetchScalarGridSpec(
                num_scalar_prefetch=0,
                grid=(n_splits, blocks_per_split),
                in_specs=[
                    pl.BlockSpec((block_rows, _LANES), in_index_map),
                    pl.BlockSpec((block_rows, _LANES), in_index_map),
                ],
                # Leading dim squeezed (None): each split owns a resident (8,128)
                # f32 block that doubles as its vector accumulator across k.
                out_specs=pl.BlockSpec((None, _ACC_ROWS, _LANES),
                                       lambda p, k: (p, 0, 0)),
            ),
            compiler_params=pltpu.CompilerParams(
                dimension_semantics=("parallel", "arbitrary"),
                vmem_limit_bytes=vmem_limit,
            ),
            cost_estimate=pl.CostEstimate(
                flops=3 * main_n,
                transcendentals=0,
                bytes_accessed=int(bytes_accessed)),
        )(e2, t2)

        total = jnp.sum(partials)

    if kernel_elems < n:
        # Tiny remainder: sub-lane tail and/or inputs too small for one tile.
        rem_e = flat_e[kernel_elems:].astype(jnp.float32)
        rem_t = flat_t[kernel_elems:].astype(jnp.float32)
        total = total + jnp.sum(jnp.abs(rem_e - rem_t))

    return total / n


def calculate_loss_forward(es: jax.Array, ta: jax.Array, is_train: bool = True):
    """JAX/Pallas equivalent of CalculateLoss(use_perceptual_gan_loss=False).forward.

    Returns a Python list with one scalar loss, matching the PyTorch module's
    `[1 * torch.abs(es - ta).mean()]` output structure.
    """
    del is_train  # only affects the (untranslated) perceptual/GAN branch
    return [1.0 * l1_mean_pallas(es, ta)]


if __name__ == "__main__":
    key = jax.random.PRNGKey(0)
    k1, k2, k3, k4 = jax.random.split(key, 4)

    # Small image-like inputs consistent with the module (NCHW, 3 channels).
    es = jax.random.normal(k1, (2, 3, 16, 16), dtype=jnp.float32)
    ta = jax.random.normal(k2, (2, 3, 16, 16), dtype=jnp.float32)

    loss = calculate_loss_forward(es, ta, is_train=True)
    result = jax.block_until_ready(loss[0])

    # Correctness vs. plain-JAX reference.
    ref = jnp.mean(jnp.abs(es - ta))
    assert jnp.allclose(result, ref, rtol=1e-5, atol=1e-6), (result, ref)

    # Extra check: sub-lane tail path (size not a multiple of 128).
    es2 = jax.random.normal(k3, (2, 3, 16, 15), dtype=jnp.float32)
    ta2 = jax.random.normal(k4, (2, 3, 16, 15), dtype=jnp.float32)
    out2 = jax.block_until_ready(l1_mean_pallas(es2, ta2))
    ref2 = jnp.mean(jnp.abs(es2 - ta2))
    assert jnp.allclose(out2, ref2, rtol=1e-5, atol=1e-6), (out2, ref2)

    # Extra check: bf16 inputs (exercises dtype-aware tiling + in-kernel cast).
    es3 = jax.random.normal(k1, (2, 3, 32, 32), dtype=jnp.bfloat16)
    ta3 = jax.random.normal(k2, (2, 3, 32, 32), dtype=jnp.bfloat16)
    out3 = jax.block_until_ready(l1_mean_pallas(es3, ta3))
    ref3 = jnp.mean(jnp.abs(es3.astype(jnp.float32) - ta3.astype(jnp.float32)))
    assert jnp.allclose(out3, ref3, rtol=1e-4, atol=1e-5), (out3, ref3)

    print("KERNEL_OK")
</pallas_src>

<mosaic_0001>
module attributes {stable_mosaic.version = 11 : i64} {
  func.func @_l1_partial_sum_kernel(%arg0: i32, %arg1: i32, %arg2: memref<8x128xf32, #tpu.memory_space<vmem>>, %arg3: memref<8x128xf32, #tpu.memory_space<vmem>>, %arg4: memref<1x8x128xf32, #tpu.memory_space<vmem>>) attributes {dimension_semantics = [#tpu.dimension_semantics<parallel>, #tpu.dimension_semantics<arbitrary>], iteration_bounds = array<i64: 2, 1>, scalar_prefetch = 0 : i64, scratch_operands = 0 : i64, tpu.core_type = #tpu.core_type<tc>, window_params = [{transform_indices = @transform_0, window_bounds = array<i64: 8, 128>}, {transform_indices = @transform_1, window_bounds = array<i64: 8, 128>}, {transform_indices = @transform_2, window_bounds = array<i64: 1, 8, 128>}]} {
    %c1_i32 = arith.constant 1 : i32
    %0 = arith.muli %arg0, %c1_i32 : i32
    %1 = arith.addi %0, %arg1 : i32
    %c0_i32 = arith.constant 0 : i32
    %2 = arith.cmpi eq, %arg1, %c0_i32 : i32
    %3 = arith.extui %2 : i1 to i32
    %c0_i32_0 = arith.constant 0 : i32
    %4 = arith.cmpi ne, %3, %c0_i32_0 : i32
    scf.if %4 {
      %cst = arith.constant 0.000000e+00 : f32
      %11 = vector.broadcast %cst : f32 to vector<8x128xf32>
      %c0 = arith.constant 0 : index
      %c0_4 = arith.constant 0 : index
      %c0_5 = arith.constant 0 : index
      %12 = vector.load %arg4[%c0, %c0_4, %c0_5] : memref<1x8x128xf32, #tpu.memory_space<vmem>>, vector<1x8x128xf32>
      %13 = vector.shape_cast %12 : vector<1x8x128xf32> to vector<8x128xf32>
      %14 = vector.shape_cast %11 : vector<8x128xf32> to vector<1x8x128xf32>
      tpu.vector_store %arg4[%c0, %c0_4, %c0_5], %14 {strides = array<i32>} : memref<1x8x128xf32, #tpu.memory_space<vmem>>, vector<1x8x128xf32>,
    } else {
    }
    %c1_i32_1 = arith.constant 1 : i32
    %5 = arith.cmpi eq, %1, %c1_i32_1 : i32
    %true = arith.constant true
    %6 = arith.xori %5, %true : i1
    %7 = arith.extui %6 : i1 to i32
    %c0_i32_2 = arith.constant 0 : i32
    %8 = arith.cmpi ne, %7, %c0_i32_2 : i32
    scf.if %8 {
      %cst = arith.constant 0.000000e+00 : f32
      %11 = vector.broadcast %cst : f32 to vector<8x128xf32>
      %c0_i32_4 = arith.constant 0 : i32
      %c8_i32 = arith.constant 8 : i32
      %12 = arith.muli %c0_i32_4, %c8_i32 : i32
      %13 = tpu.assume_multiple %12, 8 : i32
      %14 = arith.index_cast %13 : i32 to index
      %c0 = arith.constant 0 : index
      %15 = vector.load %arg2[%14, %c0] : memref<8x128xf32, #tpu.memory_space<vmem>>, vector<8x128xf32>
      %16 = arith.index_cast %13 : i32 to index
      %c0_5 = arith.constant 0 : index
      %17 = vector.load %arg3[%16, %c0_5] : memref<8x128xf32, #tpu.memory_space<vmem>>, vector<8x128xf32>
      %18 = arith.subf %15, %17 : vector<8x128xf32>
      %19 = math.absf %18 : vector<8x128xf32>
      %20 = vector.shape_cast %19 : vector<8x128xf32> to vector<1x8x128xf32>
      %cst_6 = arith.constant dense<0.000000e+00> : vector<8x128xf32>
      %21 = vector.multi_reduction <add>, %20, %cst_6 [0] : vector<1x8x128xf32> to vector<8x128xf32>
      %22 = arith.addf %11, %21 : vector<8x128xf32>
      %c1_i32_7 = arith.constant 1 : i32
      %c0_8 = arith.constant 0 : index
      %c0_9 = arith.constant 0 : index
      %c0_10 = arith.constant 0 : index
      %23 = vector.load %arg4[%c0_8, %c0_9, %c0_10] : memref<1x8x128xf32, #tpu.memory_space<vmem>>, vector<1x8x128xf32>
      %24 = vector.shape_cast %23 : vector<1x8x128xf32> to vector<8x128xf32>
      %25 = arith.addf %24, %22 : vector<8x128xf32>
      %c0_11 = arith.constant 0 : index
      %c0_12 = arith.constant 0 : index
      %c0_13 = arith.constant 0 : index
      %26 = vector.load %arg4[%c0_11, %c0_12, %c0_13] : memref<1x8x128xf32, #tpu.memory_space<vmem>>, vector<1x8x128xf32>
      %27 = vector.shape_cast %26 : vector<1x8x128xf32> to vector<8x128xf32>
      %28 = vector.shape_cast %25 : vector<8x128xf32> to vector<1x8x128xf32>
      tpu.vector_store %arg4[%c0_11, %c0_12, %c0_13], %28 {strides = array<i32>} : memref<1x8x128xf32, #tpu.memory_space<vmem>>, vector<1x8x128xf32>,
    } else {
    }
    %9 = arith.extui %5 : i1 to i32
    %c0_i32_3 = arith.constant 0 : i32
    %10 = arith.cmpi ne, %9, %c0_i32_3 : i32
    scf.if %10 {
      %cst = arith.constant 0.000000e+00 : f32
      %11 = vector.broadcast %cst : f32 to vector<8x128xf32>
      %c0_i32_4 = arith.constant 0 : i32
      %c8_i32 = arith.constant 8 : i32
      %12 = arith.muli %c0_i32_4, %c8_i32 : i32
      %13 = tpu.assume_multiple %12, 8 : i32
      %14 = arith.index_cast %13 : i32 to index
      %c0 = arith.constant 0 : index
      %15 = vector.load %arg2[%14, %c0] : memref<8x128xf32, #tpu.memory_space<vmem>>, vector<8x128xf32>
      %16 = arith.index_cast %13 : i32 to index
      %c0_5 = arith.constant 0 : index
      %17 = vector.load %arg3[%16, %c0_5] : memref<8x128xf32, #tpu.memory_space<vmem>>, vector<8x128xf32>
      %18 = arith.subf %15, %17 : vector<8x128xf32>
      %19 = math.absf %18 : vector<8x128xf32>
      %c8_i32_6 = arith.constant 8 : i32
      %20 = arith.muli %1, %c8_i32_6 : i32
      %c8_i32_7 = arith.constant 8 : i32
      %21 = arith.muli %c0_i32_4, %c8_i32_7 : i32
      %22 = arith.addi %20, %21 : i32
      %23 = tpu.iota {dimensions = array<i32: 0>} : vector<8x128xi32>
      %24 = vector.broadcast %22 : i32 to vector<8x128xi32>
      %25 = arith.addi %24, %23 : vector<8x128xi32>
      %c12_i32 = arith.constant 12 : i32
      %26 = vector.broadcast %c12_i32 : i32 to vector<8x128xi32>
      %27 = arith.cmpi slt, %25, %26 : vector<8x128xi32>
      %cst_8 = arith.constant 0.000000e+00 : f32
      %28 = vector.broadcast %cst_8 : f32 to vector<8x128xf32>
      %29 = arith.select %27, %19, %28 : vector<8x128xi1>, vector<8x128xf32>
      %30 = vector.shape_cast %29 : vector<8x128xf32> to vector<1x8x128xf32>
      %cst_9 = arith.constant dense<0.000000e+00> : vector<8x128xf32>
      %31 = vector.multi_reduction <add>, %30, %cst_9 [0] : vector<1x8x128xf32> to vector<8x128xf32>
      %32 = arith.addf %11, %31 : vector<8x128xf32>
      %c1_i32_10 = arith.constant 1 : i32
      %c0_11 = arith.constant 0 : index
      %c0_12 = arith.constant 0 : index
      %c0_13 = arith.constant 0 : index
      %33 = vector.load %arg4[%c0_11, %c0_12, %c0_13] : memref<1x8x128xf32, #tpu.memory_space<vmem>>, vector<1x8x128xf32>
      %34 = vector.shape_cast %33 : vector<1x8x128xf32> to vector<8x128xf32>
      %35 = arith.addf %34, %32 : vector<8x128xf32>
      %c0_14 = arith.constant 0 : index
      %c0_15 = arith.constant 0 : index
      %c0_16 = arith.constant 0 : index
      %36 = vector.load %arg4[%c0_14, %c0_15, %c0_16] : memref<1x8x128xf32, #tpu.memory_space<vmem>>, vector<1x8x128xf32>
      %37 = vector.shape_cast %36 : vector<1x8x128xf32> to vector<8x128xf32>
      %38 = vector.shape_cast %35 : vector<8x128xf32> to vector<1x8x128xf32>
      tpu.vector_store %arg4[%c0_14, %c0_15, %c0_16], %38 {strides = array<i32>} : memref<1x8x128xf32, #tpu.memory_space<vmem>>, vector<1x8x128xf32>,
    } else {
    }
    return
  }
  func.func @transform_0(%arg0: i32, %arg1: i32) -> (i32, i32) {
    %c1_i32 = arith.constant 1 : i32
    %0 = arith.muli %arg0, %c1_i32 : i32
    %1 = arith.addi %0, %arg1 : i32
    %c0_i32 = arith.constant 0 : i32
    %c0_i32_0 = arith.constant 0 : i32
    return %1, %c0_i32 : i32, i32
  }
  func.func @transform_1(%arg0: i32, %arg1: i32) -> (i32, i32) {
    %c1_i32 = arith.constant 1 : i32
    %0 = arith.muli %arg0, %c1_i32 : i32
    %1 = arith.addi %0, %arg1 : i32
    %c0_i32 = arith.constant 0 : i32
    %c0_i32_0 = arith.constant 0 : i32
    return %1, %c0_i32 : i32, i32
  }
  func.func @transform_2(%arg0: i32, %arg1: i32) -> (i32, i32, i32) {
    %c0_i32 = arith.constant 0 : i32
    %c0_i32_0 = arith.constant 0 : i32
    %c0_i32_1 = arith.constant 0 : i32
    return %arg0, %c0_i32, %c0_i32_0 : i32, i32, i32
  }
}

</mosaic_0001>

<bundles_post_ra>
// kernel: tpu_custom_call.1
= control target key start
LH: loop header
LB: loop body
LE: loop exit
PB: predicated region body
PF: predicated region fallthrough
CT: control target
= control target key end

     0   :  { %7 = vsyncpa [#allocation3], 0  ;;  %s768_s0 = inlined_call_operand.hbm [shape: f32[12,128], index: 0, kind: input, shape index: {}]   ;;  %s769_s1 = inlined_call_operand.hbm [shape: f32[12,128], index: 1, kind: input, shape index: {}]   ;;  %s770_s2 = inlined_call_operand.hbm [shape: f32[2,8,128], index: 2, kind: output, shape index: {}]  }
   0x1   :  { %9 = vsyncpa [#allocation3 + $0x1], 0 }
   0x2   :  { %10 = vsyncpa [#allocation6], 0 }
   0x3   :  { %12 = vsyncpa [#allocation6 + $0x1], 0 }
   0x4   :  { %13 = vsyncpa [#allocation4], 0 }
   0x5   :  { %15 = vsyncpa [#allocation4 + $0x1], 0  ;;  %s629_s9 = smov 0   ;;  %s631_s10 = smov 0  }
   0x6   :  { %s633_s11 = smov 0   ;;  %s635_s12 = smov 0  }
   0x7   :  { %s637_s13 = smov 0   ;;  %s639_s14 = smov 0  }
   0x8 LB: > { %s378_s15 = sadd.s32 4294967295, %s611_s14   ;;  %s379_s16 = sadd.s32 4294967294, %s611_s14   ;;  %s611_s14 = sphi %s639_s14, %s21_s14   ;;  %s607_s13 = sphi %s637_s13, %s779_s13   ;;  %s603_s12 = sphi %s635_s12, %s778_s12   ;;  %s599_s11 = sphi %s633_s11, %s777_s11   ;;  %s595_s10 = sphi %s631_s10, %s776_s10   ;;  %s591_s9 = sphi %s629_s9, %s775_s9  }
   0x9   : > { %s33_s17 = sadd.s32 1, %s607_s13  ;;  %s42_s18 = sadd.s32 1, %s599_s11 }
   0xa   : > { %p35_p0 = scmp.ge.s32.totalorder %s33_s17, 2  ;;  %p49_p1 = scmp.ne.s32.totalorder %s599_s11, %s595_s10 }
   0xb   : > { %p50_p2 = scmp.eq.s32.totalorder %s611_s14, 0  ;;  %p55_p3 = scmp.ne.s32.totalorder %s595_s10, %s591_s9 }
   0xc   : > { %s781_s17 = smov (%p35_p0, %s33_s17), 0  ;;  %p56_p5 = scmp.eq.s32.totalorder %s378_s15, 0 }
   0xd   : > { %p670_p4 = por %p50_p2, %p49_p1  ;;  %s39_s20 = ssub.s32 %s607_s13, %s781_s17 }
   0xe   : > { %p107_p6 = scmp.eq.s32.totalorder %s378_s15, 1  ;;  %p40_p7 = scmp.eq.s32.totalorder %s39_s20, 0 }
   0xf   : > { %p676_p8 = por %p56_p5, %p55_p3  ;;  %p113_p10 = scmp.eq.s32.totalorder %s379_s16, 1 }
  0x10   : > { %p680_p9 = por %p107_p6, %p49_p1  ;;  %p381_p12 = scmp.ge.s32.totalorder %s611_s14, 2 }
  0x11   : > { %s685_s23 = scalar_select %p40_p7, %s599_s11, %s42_s18  }
  0x12   : > { %p687_p11 = por %p113_p10, %p55_p3  ;;  %p414_p13 = scmp.lt.s32.totalorder %s611_s14, 2 }
  0x13   : > { %s133_s25 = sand.u32 1, %s599_s11   ;;  %s383_s27 = sshll.u32 %s607_s13, 3 }
  0x14   : > { %s382_s26 = sshll.u32 %s133_s25, 3  ;;  %s142_s30 = scalar_lea.hbm %s768_s0, %s383_s27 }
  0x15   : > { %s137_s3 = scalar_lea.vmem [#allocation2], %s382_s26  ;;  %s144_s5 = sshll.u32 %s142_s30, 4  ;;  %s145_s5 = int_to_ptr.hbm [resolvable:$true] %s144_s5 }
  0x16   : > { %s146_s4 = sshll.u32 %s137_s3, 4  ;;  %p404_p0 = pnand %p414_p13, %p670_p4  ;;  %s147_s4 = int_to_ptr.vmem [resolvable:$true] %s146_s4 }
  0x17   : > { %p386_p1 = scmp.ge.s32.totalorder %s611_s14, 1  ;;  %p171_p2 = scmp.lt.s32.totalorder %s611_s14, 3 }
  0x18   : > { %s134_s6 = scalar_lea.sflag [#allocation3], %s133_s25  ;;  %s162_s15 = scalar_lea.hbm %s769_s1, %s383_s27 }
  0x19   : > { %406 = dma.hbm_to_vmem [thread:$0]  (!%p404_p0), %s145_s5, 128, %s147_s4, %s134_s6  }
  0x1a   : > { %p172_p3 = pnand %p386_p1, %p171_p2  ;;  %s157_s16 = scalar_lea.vmem [#allocation5], %s382_s26 }
  0x1b   : > { %s166_s18 = sshll.u32 %s157_s16, 4  ;;  %s164_s20 = sshll.u32 %s162_s15, 4  ;;  %s167_s18 = int_to_ptr.vmem [resolvable:$true] %s166_s18  ;;  %s165_s20 = int_to_ptr.hbm [resolvable:$true] %s164_s20 }
  0x1c   : > { %s154_s28 = scalar_lea.sflag [#allocation6], %s133_s25  ;;  %175 = sbr.rel (%p172_p3) target bundleno = 84 (0x54), region = 28 }
  0x1d   : > { %409 = dma.hbm_to_vmem [thread:$0]  (!%p404_p0), %s165_s20, 128, %s167_s18, %s154_s28  }
  0x1e   : > { %s706_s19 = sand.u32 (!%p172_p3), 1, %s595_s10  }
  0x1f   : > { %s387_s29 = sshll.u32 (!%p172_p3), %s706_s19, 3  ;;  %s178_s30 = scalar_lea.sflag (!%p172_p3), [#allocation3], %s706_s19 }
  0x20   : > { %s181_s3 = scalar_lea.vmem (!%p172_p3), [#allocation2], %s387_s29 }
  0x21   : > { %578 = dma.done.wait (%p676_p8), %s178_s30, 128  }
  0x22   : > { %580 = vsyncadd (%p676_p8), %s178_s30, 4294967168  ;;  %s188_s26 = scalar_lea.sflag [#allocation6], %s706_s19  ;;  %s191_s25 = scalar_lea.vmem [#allocation5], %s387_s29 }
  0x23   : > { %582 = dma.done.wait (%p676_p8), %s188_s26, 128  }
  0x24   : > { %584 = vsyncadd (%p676_p8), %s188_s26, 4294967168  ;;  %s719_s27 = scalar_lea.vmem [#allocation7], %s387_s29  ;;  %v613_v0 = vmov 0.0   ;;  %p390_p4 = scmp.eq.s32.totalorder %s603_s12, 1 }
  0x25   : > { %225 = vst [vmem:[%s719_s27] sm:$0xff] %v613_v0 }
  0x26   : > { %230 = sbr.rel (%p390_p4) target bundleno = 51 (0x33), region = 44 }
  0x2b   : > { %v231_v1 = vld [vmem:[%s181_s3] sm:$0xff]  ;;  %v232_v2 = vld [vmem:[%s191_s25] sm:$0xff] }
  0x2c   : > { %v233_v3 = vsub.f32 %v231_v1, %v232_v2  ;;  %v237_v4 = vld [vmem:[%s719_s27] sm:$0xff] }
  0x2e   : > { %v234_v5 = vand.u32 2147483647, %v233_v3 }
  0x30   : > { %v238_v6 = vadd.f32 %v237_v4, %v234_v5 }
  0x32   : > { %239 = vst [vmem:[%s719_s27] sm:$0xff] %v238_v6 }
  0x33 PF: > { %p391_p5 = scmp.ne.s32.totalorder %s603_s12, 1 }
  0x34   : > { %s392_s21 = sshll.u32 (!%p391_p5), %s603_s12, 3 }
  0x35   : > { %242 = sbr.rel (%p391_p5) target bundleno = 69 (0x45), region = 48 }
  0x3a   : > { %v243_v7 = vld [vmem:[%s181_s3] sm:$0xff]  ;;  %v244_v8 = vld [vmem:[%s191_s25] sm:$0xff]  ;;  %v248_v9 = vlaneseq  ;;  %v250_v11 = vstv %s392_s21 }
  0x3b   : > { %v245_v10 = vsub.f32 %v243_v7, %v244_v8  ;;  %v256_v15 = vld [vmem:[%s719_s27] sm:$0xff] }
  0x3c   : > { %v249_v12 = vshrl.u32 %v248_v9, 7 }
  0x3d   : > { %v246_v13 = vand.u32 2147483647, %v245_v10 }
  0x3e   : > { %v251_v14 = vadd.s32 %v250_v11, %v249_v12 }
  0x40   : > { %vm252_vm0 = vcmp.lt.s32.totalorder %v251_v14, 12 }
  0x41   : > { %v253_v16 = vsel %vm252_vm0, %v246_v13, 0.0 }
  0x42   : > { %v257_v17 = vadd.f32 %v256_v15, %v253_v16 }
  0x44   : > { %258 = vst [vmem:[%s719_s27] sm:$0xff] %v257_v17 }
  0x45 PF: > { %s394_s4 = sshll.u32 %s603_s12, 3  ;;  %s272_s8 = sshll.u32 %s719_s27, 4  ;;  %s273_s8 = int_to_ptr.vmem [resolvable:$true] %s272_s8 }
  0x46   : > { %s270_s7 = scalar_lea.hbm %s770_s2, %s394_s4  ;;  %s260_s16 = scalar_lea.sflag [#allocation4], %s706_s19 }
  0x47   : > { %s274_s15 = sshll.u32 %s270_s7, 4  ;;  %s545_s12 = scalar_lea.hbm %s770_s2, 16  ;;  %s275_s15 = int_to_ptr.hbm [resolvable:$true] %s274_s15 }
  0x48   : > { %s539_s18 = sshra.s32 %s275_s15, 4  ;;  %s540_s18 = int_to_ptr.hbm [resolvable:$true] %s539_s18 }
  0x49   : > { %s541_s20 = scalar_lea.hbm %s540_s18, 8  ;;  %p546_p10 = scmp.lt.s32.totalorder %s540_s18, %s770_s2 }
  0x4a   : > { %p542_p6 = scmp.ne.s32.totalorder %s540_s18, %s541_s20  ;;  %p547_p13 = scmp.lt.s32.totalorder %s545_s12, %s541_s20 }
  0x4c   : > { %p543_p7 = pnand %p542_p6, %p680_p9  ;;  %p548_p0 = por %p547_p13, %p546_p10 }
  0x4e   : > { %p544_p8 = pneg %p543_p7 }
  0x50   : > { %p549_p1 = pnand %p548_p0, %p544_p8 }
  0x52   : > { %552 = shalt.err (!%p549_p1)
}
  0x53   : > { %401 = dma.vmem_to_hbm [thread:$0]  (%p680_p9), %s273_s8, 128, %s275_s15, %s260_s16  }
  0x54 PF: > { %s286_s19 = sand.u32 1, %s591_s9   ;;  %p411_p2 = pnand %p381_p12, %p687_p11 }
  0x55   : > { %s287_s26 = scalar_lea.sflag [#allocation4], %s286_s19 }
  0x56   : > { %p412_p3 = pneg %p411_p2 }
  0x58   : > { %586 = dma.done.wait (%p412_p3), %s287_s26, 128  }
  0x59   : > { %588 = vsyncadd (%p412_p3), %s287_s26, 4294967168  ;;  %s21_s14 = sadd.s32 1, %s611_s14   ;;  %s775_s9 = smov %s595_s10 }
  0x5a   : > { %p18_p4 = scmp.ge.s32.totalorder %s21_s14, 4   ;;  %s776_s10 = smov %s599_s11 }
  0x5b   : > { %s777_s11 = smov %s685_s23  ;;  %s778_s12 = smov %s607_s13 }
  0x5c   : > { %s779_s13 = smov %s781_s17  ;;  %20 = sbr.rel (!%p18_p4) target bundleno = 8 (0x8), region = 98 }
  0x61   :  { %293 = vsyncpa [#allocation3], 1 }
  0x62   :  { %295 = vsyncpa [#allocation3 + $0x1], 1 }
  0x63   :  { %296 = vsyncpa [#allocation6], 1 }
  0x64   :  { %298 = vsyncpa [#allocation6 + $0x1], 1 }
  0x65   :  { %299 = vsyncpa [#allocation4], 1 }
  0x66   :  { %301 = vsyncpa [#allocation4 + $0x1], 1 }

</bundles_post_ra>
